<compile_context>
chip_gen: v5e
topology: v5e:2x2
jax: 0.10.0
libtpu: 0.0.40
codegen_flags: <defaults>
</compile_context>

<pallas_src>
import jax
import jax.numpy as jnp
from jax import lax
from jax.experimental import pallas as pl
from jax.experimental.pallas import tpu as pltpu


def convnet_fused_kernel(p_ref, w_ref, b_ref, wc_ref, bc_ref, o_ref, feat_ref):
    """Fully fused ConvNet forward.

    p_ref:    (Cin*9, 4*B*S)  im2col patches, columns ordered (quadrant, b, s)
    w_ref:    (Cout, Cin*9)   conv weight with BN scale folded in
    b_ref:    (Cout, 1)       conv bias + BN shift folded in
    wc_ref:   (Cout*S, n_out) pre-composed fc1..fc4 weight
    bc_ref:   (1, n_out)      pre-composed fc1..fc4 bias
    o_ref:    (B, n_out)      output logits
    feat_ref: (B, Cout*S)     VMEM scratch: flattened conv features (NCHW order)
    """
    cout = w_ref.shape[0]
    batch, n_feat = feat_ref.shape
    s = n_feat // cout           # Hh * Wh (spatial size after pooling)
    bs = batch * s               # columns per pooling quadrant (lane-aligned: 128)

    # Conv2d(3x3, pad=1) (+ BN scale folded into the weight) as one transposed
    # im2col matmul -> lane-dense (Cout, 4*B*S).
    y = jnp.dot(w_ref[...], p_ref[...],
                preferred_element_type=jnp.float32)                # (Cout, 4*B*S)

    # MaxPool2d(2): max over the 4 lane-aligned quadrant column blocks.
    pooled = y[:, 0:bs]
    for q in range(1, 4):
        pooled = jnp.maximum(pooled, y[:, q * bs:(q + 1) * bs])    # (Cout, B*S)

    # Folded bias/BN-shift + ReLU AFTER pooling: per-channel constant bias
    # commutes exactly with max, and this touches 4x fewer elements.
    pooled = jnp.maximum(pooled + b_ref[...], 0.0)                 # (Cout, B*S)

    # Re-lay out to PyTorch's NCHW flatten order: feat[b, c*S + s] (all static
    # slices; writes every element of the scratch).
    for b in range(batch):
        for c in range(cout):
            feat_ref[pl.ds(b, 1), pl.ds(c * s, s)] = (
                pooled[c:c + 1, b * s:(b + 1) * s])

    # fc1 -> fc2 -> fc3 -> fc4, pre-composed into a single affine map in the
    # wrapper (exact: there is no nonlinearity between the Linear layers).
    out = jnp.dot(feat_ref[...], wc_ref[...],
                  preferred_element_type=jnp.float32) + bc_ref[...]
    o_ref[...] = out.astype(o_ref.dtype)


def _im2col_pool_quadrant_patches(x):
    """x: (B, Cin, H, W) NCHW.  Returns (Cin*9, 4*B*Hh*Wh) patches.

    Row order: (ci, ky, kx) -- matches conv_w.reshape(Cout, Cin*9).
    Column order: (quadrant, batch, spatial s=hh*Wh+wh), quadrant-major so the
    kernel's maxpool uses 128-lane-aligned column blocks.
    """
    B, Cin, H, W = x.shape
    Hh, Wh = H // 2, W // 2
    xpad = jnp.pad(x, ((0, 0), (0, 0), (1, 1), (1, 1)))
    taps = []
    for ky in range(3):
        for kx in range(3):
            taps.append(xpad[:, :, ky:ky + H, kx:kx + W])          # (B,Cin,H,W)
    taps = jnp.stack(taps, axis=2)                                  # (B,Cin,9,H,W)
    quads = []
    for qy in range(2):
        for qx in range(2):
            q = taps[:, :, :, qy::2, qx::2]                         # (B,Cin,9,Hh,Wh)
            q = q.transpose(0, 3, 4, 1, 2).reshape(B, Hh * Wh, Cin * 9)
            quads.append(q)
    patches = jnp.stack(quads, axis=0)                              # (4,B,S,F)
    patches = patches.reshape(4 * B * Hh * Wh, Cin * 9).T           # (F, 4*B*S)
    return patches, (Hh, Wh)


def init_params(key, image_shape, outputs):
    """Deterministic synthetic parameters matching the PyTorch module shapes."""
    cin, H, W = image_shape
    cout, k = 3, 3                        # fixed in the module
    units = cout * (H // 2) * (W // 2)    # numel after conv1 for one image
    keys = jax.random.split(key, 12)
    p = {}
    p["conv_w"] = 0.1 * jax.random.normal(keys[0], (cout, cin, k, k), jnp.float32)
    p["conv_b"] = 0.1 * jax.random.normal(keys[1], (cout,), jnp.float32)
    p["bn_gamma"] = 1.0 + 0.1 * jax.random.normal(keys[2], (cout,), jnp.float32)
    p["bn_beta"] = 0.1 * jax.random.normal(keys[3], (cout,), jnp.float32)
    p["bn_mean"] = jnp.zeros((cout,), jnp.float32)
    p["bn_var"] = jnp.ones((cout,), jnp.float32)
    fc_dims = [(units, units), (units, units), (units, units), (outputs, units)]
    for i, (o, n_in) in enumerate(fc_dims):
        # torch nn.Linear stores weight as (out, in)
        p[f"fc{i+1}_w"] = (1.0 / jnp.sqrt(n_in)) * jax.random.normal(
            keys[4 + 2 * i], (o, n_in), jnp.float32)
        p[f"fc{i+1}_b"] = 0.1 * jax.random.normal(
            keys[5 + 2 * i], (o,), jnp.float32)
    return p


@jax.jit
def convnet_forward(x, params):
    B, Cin, H, W = x.shape
    Cout = params["conv_w"].shape[0]
    n_out = params["fc4_w"].shape[0]

    patches, (Hh, Wh) = _im2col_pool_quadrant_patches(x)
    S = Hh * Wh

    # Fold BatchNorm (eval-mode) affine and the conv bias into the conv weights.
    eps = 1e-5
    scale = params["bn_gamma"] / jnp.sqrt(params["bn_var"] + eps)
    shift = params["bn_beta"] - params["bn_mean"] * scale
    wfold = params["conv_w"].reshape(Cout, Cin * 9) * scale[:, None]   # (Cout, Cin*9)
    bfold = (params["conv_b"] * scale + shift)[:, None]                # (Cout, 1)

    # Pre-compose fc1..fc4 (no nonlinearity between them) into one affine map.
    wc = (params["fc1_w"].T @ params["fc2_w"].T
          @ params["fc3_w"].T @ params["fc4_w"].T)                     # (units, n_out)
    bc = params["fc1_b"]
    bc = bc @ params["fc2_w"].T + params["fc2_b"]
    bc = bc @ params["fc3_w"].T + params["fc3_b"]
    bc = bc @ params["fc4_w"].T + params["fc4_b"]
    bc = bc.reshape(1, n_out)

    vmem = pl.BlockSpec(memory_space=pltpu.MemorySpace.VMEM)
    return pl.pallas_call(
        convnet_fused_kernel,
        out_shape=jax.ShapeDtypeStruct((B, n_out), jnp.float32),
        in_specs=[vmem] * 5,
        out_specs=vmem,
        scratch_shapes=[pltpu.VMEM((B, Cout * S), jnp.float32)],
    )(patches, wfold, bfold, wc, bc)


def reference_forward(x, params):
    """Pure-JAX reference (eval-mode BN, sequential fc1..fc4)."""
    eps = 1e-5
    y = lax.conv_general_dilated(
        x, params["conv_w"], window_strides=(1, 1), padding="SAME",
        dimension_numbers=("NCHW", "OIHW", "NCHW"))
    y = y + params["conv_b"][None, :, None, None]
    scale = params["bn_gamma"] / jnp.sqrt(params["bn_var"] + eps)
    shift = params["bn_beta"] - params["bn_mean"] * scale
    y = y * scale[None, :, None, None] + shift[None, :, None, None]
    y = lax.reduce_window(y, -jnp.inf, lax.max,
                          (1, 1, 2, 2), (1, 1, 2, 2), "VALID")
    y = jnp.maximum(y, 0.0)
    f = y.reshape(x.shape[0], -1)
    f = f @ params["fc1_w"].T + params["fc1_b"]
    f = f @ params["fc2_w"].T + params["fc2_b"]
    f = f @ params["fc3_w"].T + params["fc3_b"]
    f = f @ params["fc4_w"].T + params["fc4_b"]
    return f


if __name__ == "__main__":
    outputs = 10
    image_shape = (4, 16, 16)   # (C, H, W) -> units = 3 * 8 * 8 = 192
    B = 2

    key = jax.random.PRNGKey(0)
    kx, kp = jax.random.split(key)
    x = jax.random.normal(kx, (B,) + image_shape, dtype=jnp.float32)
    params = init_params(kp, image_shape, outputs)

    out = convnet_forward(x, params)
    jax.block_until_ready(out)
    assert out.shape == (B, outputs), out.shape

    ref = reference_forward(x, params)
    jax.block_until_ready(ref)
    assert jnp.allclose(out, ref, rtol=1e-3, atol=1e-3), (
        float(jnp.max(jnp.abs(out - ref))))

    print("KERNEL_OK")
</pallas_src>

<mosaic_0001>
module attributes {stable_mosaic.version = 11 : i64} {
  func.func @convnet_fused_kernel(%arg0: memref<36x512xf32, #tpu.memory_space<vmem>>, %arg1: memref<3x36xf32, #tpu.memory_space<vmem>>, %arg2: memref<3x1xf32, #tpu.memory_space<vmem>>, %arg3: memref<192x10xf32, #tpu.memory_space<vmem>>, %arg4: memref<1x10xf32, #tpu.memory_space<vmem>>, %arg5: memref<2x10xf32, #tpu.memory_space<vmem>>, %arg6: memref<2x192xf32, #tpu.memory_space<vmem>>) attributes {dimension_semantics = [], scalar_prefetch = 0 : i64, scratch_operands = 1 : i64, tpu.core_type = #tpu.core_type<tc>} {
    %c0 = arith.constant 0 : index
    %c0_0 = arith.constant 0 : index
    %0 = vector.load %arg1[%c0, %c0_0] : memref<3x36xf32, #tpu.memory_space<vmem>>, vector<3x36xf32>
    %c0_1 = arith.constant 0 : index
    %c0_2 = arith.constant 0 : index
    %1 = vector.load %arg0[%c0_1, %c0_2] : memref<36x512xf32, #tpu.memory_space<vmem>>, vector<36x512xf32>
    %cst = arith.constant dense<0.000000e+00> : vector<3x512xf32>
    %2 = tpu.matmul %0, %1, %cst {dimension_numbers = #tpu.dot_dimension_numbers<[1], [0], [0], [1], [0, 0, 1, 1], [], []>} : vector<3x36xf32>, vector<36x512xf32>, vector<3x512xf32> -> vector<3x512xf32>
    %3 = vector.extract_strided_slice %2 {offsets = [0, 0], sizes = [3, 128], strides = [1, 1]} : vector<3x512xf32> to vector<3x128xf32>
    %4 = vector.extract_strided_slice %2 {offsets = [0, 128], sizes = [3, 128], strides = [1, 1]} : vector<3x512xf32> to vector<3x128xf32>
    %5 = arith.maximumf %3, %4 : vector<3x128xf32>
    %6 = vector.extract_strided_slice %2 {offsets = [0, 256], sizes = [3, 128], strides = [1, 1]} : vector<3x512xf32> to vector<3x128xf32>
    %7 = arith.maximumf %5, %6 : vector<3x128xf32>
    %8 = vector.extract_strided_slice %2 {offsets = [0, 384], sizes = [3, 128], strides = [1, 1]} : vector<3x512xf32> to vector<3x128xf32>
    %9 = arith.maximumf %7, %8 : vector<3x128xf32>
    %c0_3 = arith.constant 0 : index
    %c0_4 = arith.constant 0 : index
    %10 = vector.load %arg2[%c0_3, %c0_4] : memref<3x1xf32, #tpu.memory_space<vmem>>, vector<3x1xf32>
    %11 = vector.broadcast %10 : vector<3x1xf32> to vector<3x128xf32>
    %12 = arith.addf %9, %11 : vector<3x128xf32>
    %cst_5 = arith.constant 0.000000e+00 : f32
    %13 = vector.broadcast %cst_5 : f32 to vector<3x128xf32>
    %14 = arith.maximumf %12, %13 : vector<3x128xf32>
    %15 = vector.extract_strided_slice %14 {offsets = [0, 0], sizes = [1, 64], strides = [1, 1]} : vector<3x128xf32> to vector<1x64xf32>
    %c0_6 = arith.constant 0 : index
    %c0_7 = arith.constant 0 : index
    %16 = vector.load %arg6[%c0_6, %c0_7] : memref<2x192xf32, #tpu.memory_space<vmem>>, vector<1x64xf32>
    tpu.vector_store %arg6[%c0_6, %c0_7], %15 {strides = array<i32>} : memref<2x192xf32, #tpu.memory_space<vmem>>, vector<1x64xf32>,
    %17 = vector.extract_strided_slice %14 {offsets = [1, 0], sizes = [1, 64], strides = [1, 1]} : vector<3x128xf32> to vector<1x64xf32>
    %c0_8 = arith.constant 0 : index
    %c64 = arith.constant 64 : index
    %18 = vector.load %arg6[%c0_8, %c64] : memref<2x192xf32, #tpu.memory_space<vmem>>, vector<1x64xf32>
    tpu.vector_store %arg6[%c0_8, %c64], %17 {strides = array<i32>} : memref<2x192xf32, #tpu.memory_space<vmem>>, vector<1x64xf32>,
    %19 = vector.extract_strided_slice %14 {offsets = [2, 0], sizes = [1, 64], strides = [1, 1]} : vector<3x128xf32> to vector<1x64xf32>
    %c0_9 = arith.constant 0 : index
    %c128 = arith.constant 128 : index
    %20 = vector.load %arg6[%c0_9, %c128] : memref<2x192xf32, #tpu.memory_space<vmem>>, vector<1x64xf32>
    tpu.vector_store %arg6[%c0_9, %c128], %19 {strides = array<i32>} : memref<2x192xf32, #tpu.memory_space<vmem>>, vector<1x64xf32>,
    %21 = vector.extract_strided_slice %14 {offsets = [0, 64], sizes = [1, 64], strides = [1, 1]} : vector<3x128xf32> to vector<1x64xf32>
    %c1 = arith.constant 1 : index
    %c0_10 = arith.constant 0 : index
    %22 = vector.load %arg6[%c1, %c0_10] : memref<2x192xf32, #tpu.memory_space<vmem>>, vector<1x64xf32>
    tpu.vector_store %arg6[%c1, %c0_10], %21 {strides = array<i32>} : memref<2x192xf32, #tpu.memory_space<vmem>>, vector<1x64xf32>,
    %23 = vector.extract_strided_slice %14 {offsets = [1, 64], sizes = [1, 64], strides = [1, 1]} : vector<3x128xf32> to vector<1x64xf32>
    %c1_11 = arith.constant 1 : index
    %c64_12 = arith.constant 64 : index
    %24 = vector.load %arg6[%c1_11, %c64_12] : memref<2x192xf32, #tpu.memory_space<vmem>>, vector<1x64xf32>
    tpu.vector_store %arg6[%c1_11, %c64_12], %23 {strides = array<i32>} : memref<2x192xf32, #tpu.memory_space<vmem>>, vector<1x64xf32>,
    %25 = vector.extract_strided_slice %14 {offsets = [2, 64], sizes = [1, 64], strides = [1, 1]} : vector<3x128xf32> to vector<1x64xf32>
    %c1_13 = arith.constant 1 : index
    %c128_14 = arith.constant 128 : index
    %26 = vector.load %arg6[%c1_13, %c128_14] : memref<2x192xf32, #tpu.memory_space<vmem>>, vector<1x64xf32>
    tpu.vector_store %arg6[%c1_13, %c128_14], %25 {strides = array<i32>} : memref<2x192xf32, #tpu.memory_space<vmem>>, vector<1x64xf32>,
    %c0_15 = arith.constant 0 : index
    %c0_16 = arith.constant 0 : index
    %27 = vector.load %arg6[%c0_15, %c0_16] : memref<2x192xf32, #tpu.memory_space<vmem>>, vector<2x192xf32>
    %c0_17 = arith.constant 0 : index
    %c0_18 = arith.constant 0 : index
    %28 = vector.load %arg3[%c0_17, %c0_18] : memref<192x10xf32, #tpu.memory_space<vmem>>, vector<192x10xf32>
    %cst_19 = arith.constant dense<0.000000e+00> : vector<2x10xf32>
    %29 = tpu.matmul %27, %28, %cst_19 {dimension_numbers = #tpu.dot_dimension_numbers<[1], [0], [0], [1], [0, 0, 1, 1], [], []>} : vector<2x192xf32>, vector<192x10xf32>, vector<2x10xf32> -> vector<2x10xf32>
    %c0_20 = arith.constant 0 : index
    %c0_21 = arith.constant 0 : index
    %30 = vector.load %arg4[%c0_20, %c0_21] : memref<1x10xf32, #tpu.memory_space<vmem>>, vector<1x10xf32>
    %31 = vector.broadcast %30 : vector<1x10xf32> to vector<2x10xf32>
    %32 = arith.addf %29, %31 : vector<2x10xf32>
    %c0_22 = arith.constant 0 : index
    %c0_23 = arith.constant 0 : index
    %33 = vector.load %arg5[%c0_22, %c0_23] : memref<2x10xf32, #tpu.memory_space<vmem>>, vector<2x10xf32>
    tpu.vector_store %arg5[%c0_22, %c0_23], %32 {strides = array<i32>} : memref<2x10xf32, #tpu.memory_space<vmem>>, vector<2x10xf32>,
    return
  }
}

</mosaic_0001>

<bundles_post_ra>
// kernel: convnet_forward.1
= control target key start
LH: loop header
LB: loop body
LE: loop exit
PB: predicated region body
PF: predicated region fallthrough
CT: control target
= control target key end

     0   :  { %vm46_vm0 = vcmask 1043456   ;;  %v313_v5 = vmov 0   ;;  %s502_s0 = inlined_call_operand.vmem [shape: f32[36,512], index: 0, kind: input, shape index: {}]   ;;  %s503_s1 = inlined_call_operand.vmem [shape: f32[3,36], index: 1, kind: input, shape index: {}]   ;;  %s504_s2 = inlined_call_operand.vmem [shape: f32[3,1], index: 2, kind: input, shape index: {}]   ;;  %s505_s3 = inlined_call_operand.vmem [shape: f32[192,10], index: 3, kind: input, shape index: {}]   ;;  %s506_s4 = inlined_call_operand.vmem [shape: f32[1,10], index: 4, kind: input, shape index: {}]   ;;  %s507_s5 = inlined_call_operand.hbm [shape: f32[2,10], index: 5, kind: output, shape index: {}]  }
   0x1   :  { %v38_v0 = vld [vmem:[%s502_s0 + $0x80] sm:$0xf]  ;;  %v39_v2 = vld [vmem:[%s502_s0 + $0x88] sm:$0xf]  ;;  %285 = vset.pattern.permute.xlu0 %v313_v5  ;;  %v41_v7 = vld [vmem:[%s502_s0 + $0x98] sm:$0xf] }
   0x2   :  { %v34_v1 = vld [vmem:[%s502_s0 + $0x60] sm:$0xff]  ;;  %273 = vmatpush.msk.msra.mxu2 %vm46_vm0, %v38_v0  ;;  %275 = vmatpush.msk.msra.mxu1 %vm46_vm0, %v39_v2  ;;  %v35_v4 = vld [vmem:[%s502_s0 + $0x68] sm:$0xff]  ;;  %v37_v9 = vld [vmem:[%s502_s0 + $0x78] sm:$0xff] }
   0x3   :  { %v30_v3 = vld [vmem:[%s502_s0 + $0x40] sm:$0xff]  ;;  %v31_v6 = vld [vmem:[%s502_s0 + $0x48] sm:$0xff]  ;;  %279 = vmatpush.msk.msra.mxu3 %vm46_vm0, %v41_v7  ;;  %v33_v11 = vld [vmem:[%s502_s0 + $0x58] sm:$0xff] }
   0x4   :  { %71 = vmatpush.msra.mxu2 %v34_v1  ;;  %v26_v8 = vld [vmem:[%s502_s0 + $0x20] sm:$0xff]  ;;  %91 = vmatpush.msra.mxu1 %v35_v4  ;;  %v27_v10 = vld [vmem:[%s502_s0 + $0x28] sm:$0xff]  ;;  %v40_v13 = vld [vmem:[%s502_s0 + $0x90] sm:$0xf] }
   0x5   :  { %v22_v12 = vld [vmem:[%s502_s0] sm:$0xff]  ;;  %131 = vmatpush.msra.mxu3 %v37_v9  ;;  %v23_v14 = vld [vmem:[%s502_s0 + $0x8] sm:$0xff] }
   0x6   :  { %72 = vmatpush.msra.mxu2 %v30_v3  ;;  %92 = vmatpush.msra.mxu1 %v31_v6  ;;  %v142_v15 = vld [vmem:[%s504_s2] sm:$0x7] }
   0x8   :  { %73 = vmatpush.msra.mxu2 %v26_v8 }
   0x9   :  { %10 = vsyncpa [#allocation4], 0  ;;  %v21_v16 = vld [vmem:[%s503_s1] sm:$0x7]  ;;  %vm42_vm1 = vcmask 293888   ;;  %93 = vmatpush.msra.mxu1 %v27_v10  ;;  %132 = vmatpush.msra.mxu3 %v33_v11  ;;  %v36_v17 = vld [vmem:[%s502_s0 + $0x70] sm:$0xff] }
   0xa   :  { %74 = vmatpush.msra.mxu2 %v22_v12  ;;  %v29_v18 = vld [vmem:[%s502_s0 + $0x38] sm:$0xff]  ;;  %145 = vperm.xlu0 %285, %v142_v15   ;;  %v32_v19 = vld [vmem:[%s502_s0 + $0x50] sm:$0xff]  ;;  %vm150_vm2 = vcmask 516096   ;;  %s314_s10 = smov 64   ;;  %v192_v39 = vld [vmem:[%s505_s3 + $0x68] sm:$0xff]  ;;  %vm158_vm3 = vcmask 1040896  }
   0xb   :  { %94 = vmatpush.msra.mxu1 %v23_v14  ;;  %274 = vmatmul.msk.f32.vlgmr.msra.gmra.mxu2 %vm42_vm1, %v21_v16  ;;  %v25_v20 = vld [vmem:[%s502_s0 + $0x18] sm:$0xff]  ;;  %v28_v21 = vld [vmem:[%s502_s0 + $0x30] sm:$0xff]  ;;  %v191_v40 = vld [vmem:[%s505_s3 + $0x60] sm:$0xff]  ;;  %vm212_vm4 = vcmask 523264   ;;  %s315_s29 = smov [#allocation3]   ;;  %s264_s8 = sshll.u32 %s507_s5, 4  ;;  %s265_s8 = int_to_ptr.hbm [resolvable:$true] %s264_s8 }
   0xc   :  { %277 = vmatpush.msk.msrb.mxu2 %vm46_vm0, %v40_v13  ;;  %276 = vmatmul.msk.f32.vlgmr.msra.gmra.mxu1 %vm42_vm1, %v21_v16  ;;  %v24_v22 = vld [vmem:[%s502_s0 + $0x10] sm:$0xff]  ;;  %v194_v37 = vld [vmem:[%s505_s3 + $0x78] sm:$0xff]  ;;  %v188_v43 = vld [vmem:[%s505_s3 + $0x48] sm:$0xff]  ;;  %s262_s30 = sshll.u32 %s315_s29, 4  ;;  %vm255_vm5 = vcmask 74752   ;;  %s263_s30 = int_to_ptr.vmem [resolvable:$true] %s262_s30 }
   0xd   :  { %133 = vmatpush.msra.mxu3 %v29_v18  ;;  %v193_v38 = vld [vmem:[%s505_s3 + $0x70] sm:$0xff]  ;;  %215 = vmatpush.msra.mxu0 %v194_v37  ;;  %v190_v41 = vld [vmem:[%s505_s3 + $0x58] sm:$0xff]  ;;  %v187_v44 = vld [vmem:[%s505_s3 + $0x40] sm:$0xff] }
   0xe   :  { %111 = vmatpush.msrb.mxu2 %v36_v17  ;;  %v189_v42 = vld [vmem:[%s505_s3 + $0x50] sm:$0xff]  ;;  %v186_v45 = vld [vmem:[%s505_s3 + $0x38] sm:$0xff]  ;;  %v184_v49 = vld [vmem:[%s505_s3 + $0x28] sm:$0xff] }
   0xf   :  { %134 = vmatpush.msra.mxu3 %v25_v20  ;;  %216 = vmatpush.msra.mxu0 %v193_v38  ;;  %v202_v46 = vld [vmem:[%s505_s3 + $0xb8] sm:$0xff]  ;;  %v185_v47 = vld [vmem:[%s505_s3 + $0x30] sm:$0xff]  ;;  %v200_v50 = vld [vmem:[%s505_s3 + $0xa8] sm:$0xff] }
  0x10   :  { %112 = vmatpush.msrb.mxu2 %v32_v19  ;;  %280 = vmatmul.msk.f32.vlgmr.msra.gmra.mxu3 %vm42_vm1, %v21_v16  ;;  %v201_v48 = vld [vmem:[%s505_s3 + $0xb0] sm:$0xff]  ;;  %v183_v51 = vld [vmem:[%s505_s3 + $0x20] sm:$0xff]  ;;  %v182_v53 = vld [vmem:[%s505_s3 + $0x18] sm:$0xff] }
  0x11   :  { %217 = vmatpush.msra.mxu0 %v192_v39  ;;  %243 = vmatpush.msrb.mxu1 %v202_v46  ;;  %v199_v52 = vld [vmem:[%s505_s3 + $0xa0] sm:$0xff]  ;;  %v198_v54 = vld [vmem:[%s505_s3 + $0x98] sm:$0xff]  ;;  %v181_v55 = vld [vmem:[%s505_s3 + $0x10] sm:$0xff] }
  0x12   :  { %113 = vmatpush.msrb.mxu2 %v28_v21  ;;  %v197_v56 = vld [vmem:[%s505_s3 + $0x90] sm:$0xff]  ;;  %v180_v57 = vld [vmem:[%s505_s3 + $0x8] sm:$0xff]  ;;  %v179_v59 = vld [vmem:[%s505_s3] sm:$0xff] }
  0x13   :  { %218 = vmatpush.msra.mxu0 %v191_v40  ;;  %244 = vmatpush.msrb.mxu1 %v201_v48  ;;  %v196_v58 = vld [vmem:[%s505_s3 + $0x88] sm:$0xff]  ;;  %v195_v60 = vld [vmem:[%s505_s3 + $0x80] sm:$0xff] }
  0x14   :  { %114 = vmatpush.msrb.mxu2 %v24_v22  ;;  %v286_v3 = vld [vmem:[%s506_s4] ss:$0 sm:$0xff] }
  0x15   :  { %278 = vmatmul.msk.f32.vlgmr.msrb.gmra.mxu2 %vm42_vm1, %v21_v16  ;;  %219 = vmatpush.msra.mxu0 %v190_v41 }
  0x16   :  { %245 = vmatpush.msrb.mxu1 %v200_v50 }
  0x17   :  { %220 = vmatpush.msra.mxu0 %v189_v42 }
  0x18   :  { %246 = vmatpush.msrb.mxu1 %v199_v52 }
  0x19   :  { %221 = vmatpush.msra.mxu0 %v188_v43 }
  0x1a   :  { %247 = vmatpush.msrb.mxu1 %v198_v54 }
  0x1b   :  { %222 = vmatpush.msra.mxu0 %v187_v44 }
  0x1c   :  { %248 = vmatpush.msrb.mxu1 %v197_v56 }
  0x1d   :  { %223 = vmatpush.msra.mxu0 %v186_v45 }
  0x1e   :  { %249 = vmatpush.msrb.mxu1 %v196_v58 }
  0x1f   :  { %224 = vmatpush.msra.mxu0 %v185_v47 }
  0x20   :  { %250 = vmatpush.msrb.mxu1 %v195_v60 }
  0x21   :  { %225 = vmatpush.msra.mxu0 %v184_v49 }
  0x23   :  { %226 = vmatpush.msra.mxu0 %v183_v51 }
  0x25   :  { %227 = vmatpush.msra.mxu0 %v182_v53 }
  0x27   :  { %228 = vmatpush.msra.mxu0 %v181_v55 }
  0x29   :  { %229 = vmatpush.msra.mxu0 %v180_v57 }
  0x2b   :  { %230 = vmatpush.msra.mxu0 %v179_v59 }
  0x7c   :  { %v146_v29 = vpop.permute.xlu0 %145 }
  0x89   :  { %v96_v24 = vpop.f32.mrf.mxu1 }
  0x8e   :  { %v76_v23 = vpop.f32.mrf.mxu2 }
  0x8f   :  { %v139_v25 = vmax.f32 %v76_v23, %v96_v24 }
  0x93   :  { %v136_v27 = vpop.f32.mrf.mxu3 }
  0x98   :  { %v116_v26 = vpop.f32.mrf.mxu2 }
  0x99   :  { %v140_v28 = vmax.f32 %v139_v25, %v116_v26 }
  0x9b   :  { %v141_v30 = vmax.f32 %v140_v28, %v136_v27 }
  0x9d   :  { %v148_v31 = vadd.f32 %v146_v29, %v141_v30 }
  0x9f   :  { %v149_v32 = vmax.f32 %v148_v31, 0.0 }
  0xa1   :  { %160 = vst.sshfl [vmem:[#allocation1] sm:$0xff pattern:$0x73625140] %v149_v32  ;;  %165 = vrot.lane.b32.xlu0 %v149_v32, %s314_s10  ;;  %v153_v33 = vrot.slane %v149_v32, 7 }
  0xa2   :  { %151 = vst.msk [vmem:[#allocation2] sm:$0x1] %vm150_vm2, %v149_v32 }
  0xa3   :  { %v154_v34 = vrot.slane %v153_v33, 2 }
  0xa5   :  { %155 = vrot.lane.b32.xlu1 %v154_v34, %s314_s10 }
  0xa8   :  { %v162_v35 = vld [vmem:[#allocation1 + $0x1] ss:$4 sm:$0xff] }
  0xa9   :  { %171 = vst.sshfl [vmem:[#allocation1] sm:$0xff pattern:$0x73625140] %v149_v32 }
  0xaa   :  { %164 = vst.msk [vmem:[#allocation2 + $0x2] sm:$0x1] %vm150_vm2, %v162_v35 }
  0xb0   :  { %v173_v36 = vld [vmem:[#allocation1 + $0x1] ss:$4 sm:$0xff] }
  0xb1   :  { %174 = vrot.lane.b32.xlu1 %v173_v36, %s314_s10 }
 0x113   :  { %v166_v61 = vpop.permute.xlu0 %165 }
 0x114   :  { %168 = vst.msk [vmem:[#allocation2 + $0x1] sm:$0x1] %vm150_vm2, %v166_v61 }
 0x115   :  { %170 = vst.msk [vmem:[#allocation2 + $0x1] sm:$0x1] %vm158_vm3, %v154_v34 }
 0x117   :  { %v156_v62 = vpop.permute.xlu1 %155 }
 0x118   :  { %159 = vst.msk [vmem:[#allocation2] sm:$0x1] %vm158_vm3, %v156_v62 }
 0x123   :  { %v175_v63 = vpop.permute.xlu1 %174 }
 0x124   :  { %177 = vst.msk [vmem:[#allocation2 + $0x3] sm:$0x1] %vm150_vm2, %v175_v63 }
 0x12b   :  { %v178_v0 = vld [vmem:[#allocation2] sm:$0xf] }
 0x12c   :  { %208 = vst [vmem:[#allocation1] ss:$4 sm:$0xff] %v178_v0 }
 0x133   :  { %v209_v1 = vld.sshfl [vmem:[#allocation1] sm:$0xff pattern:$0x73625140]  ;;  %v210_v2 = vld.sshfl [vmem:[#allocation1 + $0x8] sm:$0xff pattern:$0x73625140] }
 0x134   :  { %231 = vmatmul.f32.vlgmr.msra.gmra.mxu0 %v209_v1  ;;  %281 = vmatmul.msk.f32.vlgmr.msrb.gmra.mxu1 %vm212_vm4, %v210_v2 }
 0x1b1   :  { %v232_v4 = vpop.f32.mrf.mxu0  ;;  %v252_v6 = vpop.f32.mrf.mxu1 }
 0x1b2   :  { %v233_v5 = vadd.f32 %v286_v3, %v232_v4 }
 0x1b4   :  { %v253_v7 = vadd.f32 %v252_v6, %v233_v5 }
 0x1b6   :  { %256 = vst.msk [vmem:[#allocation3] sm:$0x3] %vm255_vm5, %v253_v7 }
 0x1b7   :  { %267 = dma.vmem_to_hbm [thread:$0]  %s263_s30, 32, %s265_s8, [#allocation4]  }
 0x1b8   :  { %311 = dma.done.wait [#allocation4], 32  }
 0x1b9   :  { %312 = vsyncadd [#allocation4], 4294967264 }
 0x1ba   :  { %272 = vsyncpa [#allocation4], 1 }

</bundles_post_ra>
